<compile_context>
chip_gen: v6e
topology: v6e:2x2x1
jax: 0.10.0
libtpu: 0.0.40
codegen_flags: <defaults>
</compile_context>

<pallas_src>
import functools

import jax
import jax.numpy as jnp
from jax.experimental import pallas as pl
from jax.experimental.pallas import tpu as pltpu


def _round_up(x, m):
    return (x + m - 1) // m * m


def _choose_tile(length, max_tile, unit=8):
    """Tile size (multiple of `unit`, <= max_tile) and the padded length."""
    t = min(max_tile, _round_up(length, unit))
    t = max(unit, (t // unit) * unit)
    padded = _round_up(length, t)
    return t, padded


# ---------------------------------------------------------------------------
# Weight prep: transpose to (in, out), fold 1/sqrt(d_k) into wq, zero-pad each
# head to a multiple of 128 lanes (exact math; keeps all per-head slices
# vreg-aligned), and cast to the MXU dtype.
# ---------------------------------------------------------------------------
def prepare_weights(wq, wk, wv, wfc, *, n_head, d_k, d_v, mxu_dtype=jnp.bfloat16):
    d_model = wq.shape[1]
    d_kp = _round_up(d_k, 128)
    d_vp = _round_up(d_v, 128)
    scale = 1.0 / (float(d_k) ** 0.5)

    def pad_proj(w, d, dp, s=1.0):
        wt = (w.T * s).reshape(d_model, n_head, d)
        wt = jnp.pad(wt, ((0, 0), (0, 0), (0, dp - d)))
        return wt.reshape(d_model, n_head * dp).astype(mxu_dtype)

    wq_t = pad_proj(wq, d_k, d_kp, scale)       # (d_model, H*d_kp), pre-scaled
    wk_t = pad_proj(wk, d_k, d_kp)              # (d_model, H*d_kp)
    wv_t = pad_proj(wv, d_v, d_vp)              # (d_model, H*d_vp)

    wfc_t = wfc.T.reshape(n_head, d_v, d_model)
    wfc_t = jnp.pad(wfc_t, ((0, 0), (0, d_vp - d_v), (0, 0)))
    wfc_t = wfc_t.reshape(n_head * d_vp, d_model).astype(mxu_dtype)
    return wq_t, wk_t, wv_t, wfc_t, d_kp, d_vp


# ---------------------------------------------------------------------------
# Flash-style kernel (no attention-probability output), online softmax over Lk.
# grid = (bs, Lq//tq, Lk//tk)
# ---------------------------------------------------------------------------
def _mha_flash_kernel(q_ref, k_ref, v_ref, wq_ref, wk_ref, wv_ref, wfc_ref,
                      out_ref, *scratch, n_head, d_kp, d_vp, tk, kv_len,
                      cache_kv, mask_kv, mxu_dtype, approx_recip):
    if cache_kv:
        qp_s, kp_s, vp_s, m_s, l_s, acc_s = scratch
    else:
        qp_s, m_s, l_s, acc_s = scratch

    qi = pl.program_id(1)
    ki = pl.program_id(2)

    @pl.when(ki == 0)
    def _init():
        # Q projection once per query tile (1/sqrt(d_k) folded into wq).
        qp_s[...] = jnp.dot(q_ref[0], wq_ref[...],
                            preferred_element_type=jnp.float32).astype(mxu_dtype)
        m_s[...] = jnp.full(m_s.shape, -jnp.inf, m_s.dtype)
        l_s[...] = jnp.zeros(l_s.shape, l_s.dtype)
        acc_s[...] = jnp.zeros(acc_s.shape, acc_s.dtype)

    if cache_kv:
        # K/V projected once per batch element (during the qi == 0 sweep) and
        # reused from VMEM for all later query tiles.
        row = pl.multiple_of(ki * tk, tk)

        @pl.when(qi == 0)
        def _project_kv():
            kp_s[pl.ds(row, tk), :] = jnp.dot(
                k_ref[0], wk_ref[...],
                preferred_element_type=jnp.float32).astype(mxu_dtype)
            vp_s[pl.ds(row, tk), :] = jnp.dot(
                v_ref[0], wv_ref[...],
                preferred_element_type=jnp.float32).astype(mxu_dtype)

        kp = kp_s[pl.ds(row, tk), :]                       # (tk, H*d_kp)
        vp = vp_s[pl.ds(row, tk), :]                       # (tk, H*d_vp)
    else:
        kp = jnp.dot(k_ref[0], wk_ref[...],
                     preferred_element_type=jnp.float32).astype(mxu_dtype)
        vp = jnp.dot(v_ref[0], wv_ref[...],
                     preferred_element_type=jnp.float32).astype(mxu_dtype)

    if mask_kv:
        kv_pos = ki * tk + jax.lax.broadcasted_iota(jnp.int32, (1, tk), 1)
        valid = kv_pos < kv_len

    # Per-head online softmax: every slice below is 128-lane aligned (d_kp/d_vp
    # are multiples of 128), so no masked stores / lane rotates in this loop.
    for h in range(n_head):
        qh = qp_s[:, h * d_kp:(h + 1) * d_kp]              # (tq, d_kp)
        kh = kp[:, h * d_kp:(h + 1) * d_kp]                # (tk, d_kp)
        vh = vp[:, h * d_vp:(h + 1) * d_vp]                # (tk, d_vp)
        s = jax.lax.dot_general(qh, kh, (((1,), (1,)), ((), ())),
                                preferred_element_type=jnp.float32)  # (tq, tk)
        if mask_kv:
            s = jnp.where(valid, s, -jnp.inf)
        m_prev = m_s[:, h:h + 1]                           # (tq, 1)
        m_new = jnp.maximum(m_prev, jnp.max(s, axis=-1, keepdims=True))
        alpha = jnp.exp(m_prev - m_new)
        p = jnp.exp(s - m_new)
        l_s[:, h:h + 1] = alpha * l_s[:, h:h + 1] + jnp.sum(p, axis=-1,
                                                            keepdims=True)
        pv = jnp.dot(p.astype(mxu_dtype), vh,
                     preferred_element_type=jnp.float32)    # (tq, d_vp)
        acc_s[:, h * d_vp:(h + 1) * d_vp] = (
            alpha * acc_s[:, h * d_vp:(h + 1) * d_vp] + pv)
        m_s[:, h:h + 1] = m_new

    @pl.when(ki == pl.num_programs(2) - 1)
    def _finalize():
        for h in range(n_head):
            inv_l = pl.reciprocal(l_s[:, h:h + 1], approx=approx_recip)  # EUP
            acc_s[:, h * d_vp:(h + 1) * d_vp] = (
                acc_s[:, h * d_vp:(h + 1) * d_vp] * inv_l)
        out_ref[0] = jnp.dot(acc_s[...].astype(mxu_dtype), wfc_ref[...],
                             preferred_element_type=jnp.float32
                             ).astype(out_ref.dtype)


# ---------------------------------------------------------------------------
# Attention-returning kernel: one head per grid step so the attn output block
# is only (1, 1, tq, len_k).  K/V projected once per batch into VMEM scratch.
# grid = (bs, Lq//tq, n_head)
# ---------------------------------------------------------------------------
def _mha_attn_kernel(q_ref, k_ref, v_ref, wqh_ref, wk_ref, wv_ref, wfch_ref,
                     out_ref, attn_ref, kp_s, vp_s, acc_s, *,
                     n_head, d_kp, d_vp, kv_len, mask_kv, mxu_dtype,
                     approx_recip):
    qi = pl.program_id(1)
    h = pl.program_id(2)

    @pl.when(jnp.logical_and(qi == 0, h == 0))
    def _project_kv():
        k_in = k_ref[0]                                    # (len_k, d_model)
        v_in = v_ref[0]
        for hh in range(n_head):
            kp_s[hh] = jnp.dot(
                k_in, wk_ref[:, hh * d_kp:(hh + 1) * d_kp],
                preferred_element_type=jnp.float32).astype(mxu_dtype)
            vp_s[hh] = jnp.dot(
                v_in, wv_ref[:, hh * d_vp:(hh + 1) * d_vp],
                preferred_element_type=jnp.float32).astype(mxu_dtype)

    @pl.when(h == 0)
    def _init():
        acc_s[...] = jnp.zeros(acc_s.shape, acc_s.dtype)

    qh = jnp.dot(q_ref[0], wqh_ref[...],
                 preferred_element_type=jnp.float32).astype(mxu_dtype)  # (tq,d_kp)
    kh = kp_s[h]                                           # (len_k, d_kp)
    vh = vp_s[h]                                           # (len_k, d_vp)
    s = jax.lax.dot_general(qh, kh, (((1,), (1,)), ((), ())),
                            preferred_element_type=jnp.float32)  # (tq, len_k)
    if mask_kv:
        kv_pos = jax.lax.broadcasted_iota(jnp.int32, (1, s.shape[-1]), 1)
        s = jnp.where(kv_pos < kv_len, s, -jnp.inf)
    s_max = jnp.max(s, axis=-1, keepdims=True)
    p = jnp.exp(s - s_max)
    denom = jnp.sum(p, axis=-1, keepdims=True)
    attn = p * pl.reciprocal(denom, approx=approx_recip)
    attn_ref[0, 0] = attn.astype(attn_ref.dtype)

    ctx_h = jnp.dot(attn.astype(mxu_dtype), vh,
                    preferred_element_type=jnp.float32)    # (tq, d_vp)
    acc_s[...] = acc_s[...] + jnp.dot(ctx_h.astype(mxu_dtype), wfch_ref[...],
                                      preferred_element_type=jnp.float32)

    @pl.when(h == n_head - 1)
    def _finalize():
        out_ref[0] = acc_s[...].astype(out_ref.dtype)


# ---------------------------------------------------------------------------
# Wrapper
# ---------------------------------------------------------------------------
def multi_head_attention(q, k, v, wq, wk, wv, wfc, *, n_head, d_k, d_v,
                         return_attn=True, attn_dtype=None,
                         mxu_dtype=jnp.bfloat16,
                         tq_max=None, tk_max=None,
                         vmem_limit_bytes=None, cache_kv=None,
                         approx_recip=True):
    """q,k,v: (bs, len, d_model). Weights in torch nn.Linear layout (out, in).

    return_attn=False uses the flash-style kernel (no O(L^2) HBM traffic).
    """
    bs, len_q, d_model = q.shape
    len_k = k.shape[1]
    residual = q
    out_dtype = q.dtype

    # --- hardware-aware defaults (v7x: ~64 MiB VMEM per TensorCore) ----------
    try:
        vmem_cap = int(getattr(pltpu.get_tpu_info(), "vmem_capacity_bytes",
                               128 * 1024 * 1024))
    except Exception:  # pragma: no cover - CPU / older-jax fallback
        vmem_cap = 128 * 1024 * 1024
    small_vmem = vmem_cap < 100 * 1024 * 1024
    if tq_max is None:
        tq_max = 256 if small_vmem else 512
    if tk_max is None:
        tk_max = 256 if small_vmem else 512
    if vmem_limit_bytes is None:
        vmem_limit_bytes = int(min(vmem_cap * 3 // 4, 100 * 1024 * 1024))

    wq_t, wk_t, wv_t, wfc_t, d_kp, d_vp = prepare_weights(
        wq, wk, wv, wfc, n_head=n_head, d_k=d_k, d_v=d_v, mxu_dtype=mxu_dtype)

    # Stream activations in the MXU dtype; the residual add is done afterwards
    # on the original (f32) q so no precision is lost there.
    q_x = q.astype(mxu_dtype)
    k_x = k.astype(mxu_dtype)
    v_x = v.astype(mxu_dtype)

    tq, len_q_p = _choose_tile(len_q, tq_max)
    if len_q_p != len_q:
        q_x = jnp.pad(q_x, ((0, 0), (0, len_q_p - len_q), (0, 0)))

    if not return_attn:
        # -------------------- flash path (fast path) -------------------------
        tk, len_k_p = _choose_tile(len_k, tk_max)
        if len_k_p != len_k:
            k_x = jnp.pad(k_x, ((0, 0), (0, len_k_p - len_k), (0, 0)))
            v_x = jnp.pad(v_x, ((0, 0), (0, len_k_p - len_k), (0, 0)))
        mask_kv = len_k_p != len_k
        if cache_kv is None:
            cache_bytes = (len_k_p * n_head * (d_kp + d_vp)
                           * jnp.dtype(mxu_dtype).itemsize)
            cache_kv = cache_bytes * 3 <= vmem_limit_bytes

        kernel = functools.partial(
            _mha_flash_kernel, n_head=n_head, d_kp=d_kp, d_vp=d_vp, tk=tk,
            kv_len=len_k, cache_kv=cache_kv, mask_kv=mask_kv,
            mxu_dtype=mxu_dtype, approx_recip=approx_recip)

        if cache_kv:
            # Raw K/V tiles are only consumed while qi == 0; keep the block
            # index constant afterwards so they are not re-fetched from HBM.
            kv_map = lambda b, qi, ki: (b, jnp.where(qi == 0, ki, 0), 0)
        else:
            kv_map = lambda b, qi, ki: (b, ki, 0)

        scratch = [pltpu.VMEM((tq, n_head * d_kp), mxu_dtype)]          # Q proj
        if cache_kv:
            scratch += [pltpu.VMEM((len_k_p, n_head * d_kp), mxu_dtype),  # K proj
                        pltpu.VMEM((len_k_p, n_head * d_vp), mxu_dtype)]  # V proj
        scratch += [pltpu.VMEM((tq, n_head), jnp.float32),               # run max
                    pltpu.VMEM((tq, n_head), jnp.float32),               # run sum
                    pltpu.VMEM((tq, n_head * d_vp), jnp.float32)]        # acc

        grid_spec = pltpu.PrefetchScalarGridSpec(
            num_scalar_prefetch=0,
            grid=(bs, len_q_p // tq, len_k_p // tk),
            in_specs=[
                pl.BlockSpec((1, tq, d_model), lambda b, qi, ki: (b, qi, 0)),
                pl.BlockSpec((1, tk, d_model), kv_map),
                pl.BlockSpec((1, tk, d_model), kv_map),
                pl.BlockSpec((d_model, n_head * d_kp), lambda b, qi, ki: (0, 0)),
                pl.BlockSpec((d_model, n_head * d_kp), lambda b, qi, ki: (0, 0)),
                pl.BlockSpec((d_model, n_head * d_vp), lambda b, qi, ki: (0, 0)),
                pl.BlockSpec((n_head * d_vp, d_model), lambda b, qi, ki: (0, 0)),
            ],
            out_specs=pl.BlockSpec((1, tq, d_model), lambda b, qi, ki: (b, qi, 0)),
            scratch_shapes=scratch,
        )
        dims = (("parallel", "arbitrary", "arbitrary") if cache_kv
                else ("parallel", "parallel", "arbitrary"))
        out = pl.pallas_call(
            kernel,
            out_shape=jax.ShapeDtypeStruct((bs, len_q_p, d_model), jnp.float32),
            grid_spec=grid_spec,
            compiler_params=pltpu.CompilerParams(
                dimension_semantics=dims, vmem_limit_bytes=vmem_limit_bytes),
        )(q_x, k_x, v_x, wq_t, wk_t, wv_t, wfc_t)
        attn = None
    else:
        # ------------- module-faithful path: returns (out, attn) -------------
        len_k_p = _round_up(len_k, 8)
        if len_k_p != len_k:
            k_x = jnp.pad(k_x, ((0, 0), (0, len_k_p - len_k), (0, 0)))
            v_x = jnp.pad(v_x, ((0, 0), (0, len_k_p - len_k), (0, 0)))
        mask_kv = len_k_p != len_k
        attn_out_dtype = attn_dtype if attn_dtype is not None else out_dtype

        kernel = functools.partial(
            _mha_attn_kernel, n_head=n_head, d_kp=d_kp, d_vp=d_vp,
            kv_len=len_k, mask_kv=mask_kv, mxu_dtype=mxu_dtype,
            approx_recip=approx_recip)

        grid_spec = pltpu.PrefetchScalarGridSpec(
            num_scalar_prefetch=0,
            grid=(bs, len_q_p // tq, n_head),
            in_specs=[
                pl.BlockSpec((1, tq, d_model), lambda b, qi, h: (b, qi, 0)),
                pl.BlockSpec((1, len_k_p, d_model), lambda b, qi, h: (b, 0, 0)),
                pl.BlockSpec((1, len_k_p, d_model), lambda b, qi, h: (b, 0, 0)),
                pl.BlockSpec((d_model, d_kp), lambda b, qi, h: (0, h)),      # wq[h]
                pl.BlockSpec((d_model, n_head * d_kp), lambda b, qi, h: (0, 0)),
                pl.BlockSpec((d_model, n_head * d_vp), lambda b, qi, h: (0, 0)),
                pl.BlockSpec((d_vp, d_model), lambda b, qi, h: (h, 0)),      # fc[h]
            ],
            out_specs=[
                pl.BlockSpec((1, tq, d_model), lambda b, qi, h: (b, qi, 0)),
                pl.BlockSpec((1, 1, tq, len_k_p), lambda b, qi, h: (b, h, qi, 0)),
            ],
            scratch_shapes=[
                pltpu.VMEM((n_head, len_k_p, d_kp), mxu_dtype),   # K proj slabs
                pltpu.VMEM((n_head, len_k_p, d_vp), mxu_dtype),   # V proj slabs
                pltpu.VMEM((tq, d_model), jnp.float32),           # fc accumulator
            ],
        )
        out, attn = pl.pallas_call(
            kernel,
            out_shape=(
                jax.ShapeDtypeStruct((bs, len_q_p, d_model), jnp.float32),
                jax.ShapeDtypeStruct((bs, n_head, len_q_p, len_k_p),
                                     attn_out_dtype),
            ),
            grid_spec=grid_spec,
            compiler_params=pltpu.CompilerParams(
                dimension_semantics=("parallel", "arbitrary", "arbitrary"),
                vmem_limit_bytes=vmem_limit_bytes),
        )(q_x, k_x, v_x, wq_t, wk_t, wv_t, wfc_t)
        if len_q_p != len_q or len_k_p != len_k:
            attn = attn[:, :, :len_q, :len_k]

    if len_q_p != len_q:
        out = out[:, :len_q]
    out = (out + residual.astype(jnp.float32)).astype(out_dtype)
    return out, attn


# ---------------------------------------------------------------------------
# Pure-JAX reference (PyTorch forward, eval mode)
# ---------------------------------------------------------------------------
def _reference(q, k, v, wq, wk, wv, wfc, *, n_head, d_k, d_v):
    bs, len_q, d_model = q.shape
    len_k = k.shape[1]
    temperature = float(d_k) ** 0.5
    residual = q
    qp = (q @ wq.T).reshape(bs, len_q, n_head, d_k).transpose(0, 2, 1, 3)
    kp = (k @ wk.T).reshape(bs, len_k, n_head, d_k).transpose(0, 2, 1, 3)
    vp = (v @ wv.T).reshape(bs, len_k, n_head, d_v).transpose(0, 2, 1, 3)
    scores = jnp.einsum('bhqd,bhkd->bhqk', qp / temperature, kp)
    attn = jax.nn.softmax(scores, axis=-1)
    ctx = jnp.einsum('bhqk,bhkd->bhqd', attn, vp)
    ctx = ctx.transpose(0, 2, 1, 3).reshape(bs, len_q, n_head * d_v)
    out = ctx @ wfc.T + residual
    return out, attn


def _make_inputs(key, bs, len_q, len_k, d_model, n_head, d_k, d_v):
    kq, kk, kv_, kwq, kwk, kwv, kwfc = jax.random.split(key, 7)
    q = jax.random.normal(kq, (bs, len_q, d_model), dtype=jnp.float32)
    k = jax.random.normal(kk, (bs, len_k, d_model), dtype=jnp.float32)
    v = jax.random.normal(kv_, (bs, len_k, d_model), dtype=jnp.float32)
    # torch nn.Linear layout: (out_features, in_features)
    wq = 0.1 * jax.random.normal(kwq, (n_head * d_k, d_model), dtype=jnp.float32)
    wk = 0.1 * jax.random.normal(kwk, (n_head * d_k, d_model), dtype=jnp.float32)
    wv = 0.1 * jax.random.normal(kwv, (n_head * d_v, d_model), dtype=jnp.float32)
    wfc = 0.1 * jax.random.normal(kwfc, (d_model, n_head * d_v), dtype=jnp.float32)
    return q, k, v, wq, wk, wv, wfc


if __name__ == "__main__":
    key = jax.random.PRNGKey(0)

    # --- Case 1: small shapes, both kernel variants --------------------------
    bs, len_q, len_k = 2, 8, 8
    d_model, n_head, d_k, d_v = 32, 4, 8, 8
    q, k, v, wq, wk, wv, wfc = _make_inputs(key, bs, len_q, len_k,
                                            d_model, n_head, d_k, d_v)
    out_ref, attn_ref = _reference(q, k, v, wq, wk, wv, wfc,
                                   n_head=n_head, d_k=d_k, d_v=d_v)

    out, attn = multi_head_attention(q, k, v, wq, wk, wv, wfc,
                                     n_head=n_head, d_k=d_k, d_v=d_v,
                                     return_attn=True)
    jax.block_until_ready(out)
    jax.block_until_ready(attn)
    assert out.shape == (bs, len_q, d_model)
    assert attn.shape == (bs, n_head, len_q, len_k)
    assert jnp.allclose(out, out_ref, atol=5e-2, rtol=5e-2)
    assert jnp.allclose(attn, attn_ref, atol=5e-3, rtol=5e-2)

    out_f, _ = multi_head_attention(q, k, v, wq, wk, wv, wfc,
                                    n_head=n_head, d_k=d_k, d_v=d_v,
                                    return_attn=False)
    jax.block_until_ready(out_f)
    assert jnp.allclose(out_f, out_ref, atol=5e-2, rtol=5e-2)

    # --- Case 2: multi-tile flash accumulation, cached and uncached K/V ------
    key2 = jax.random.PRNGKey(0)
    bs2, len2, dm2, h2, dk2, dv2 = 2, 256, 128, 4, 32, 32
    q2, k2, v2, wq2, wk2, wv2, wfc2 = _make_inputs(key2, bs2, len2, len2,
                                                   dm2, h2, dk2, dv2)
    out2_ref, _ = _reference(q2, k2, v2, wq2, wk2, wv2, wfc2,
                             n_head=h2, d_k=dk2, d_v=dv2)
    for ck in (True, False):
        out2, _ = multi_head_attention(q2, k2, v2, wq2, wk2, wv2, wfc2,
                                       n_head=h2, d_k=dk2, d_v=dv2,
                                       return_attn=False, tq_max=128,
                                       tk_max=128, cache_kv=ck)
        jax.block_until_ready(out2)
        assert out2.shape == (bs2, len2, dm2)
        assert jnp.allclose(out2, out2_ref, atol=5e-2, rtol=5e-2)

    # --- Case 3: awkward lengths -> padding + in-kernel key masking ----------
    key3 = jax.random.PRNGKey(0)
    bs3, lq3, lk3, dm3, h3, dk3, dv3 = 2, 201, 203, 64, 2, 16, 16
    q3, k3, v3, wq3, wk3, wv3, wfc3 = _make_inputs(key3, bs3, lq3, lk3,
                                                   dm3, h3, dk3, dv3)
    out3_ref, attn3_ref = _reference(q3, k3, v3, wq3, wk3, wv3, wfc3,
                                     n_head=h3, d_k=dk3, d_v=dv3)
    out3, attn3 = multi_head_attention(q3, k3, v3, wq3, wk3, wv3, wfc3,
                                       n_head=h3, d_k=dk3, d_v=dv3,
                                       return_attn=True, tq_max=128,
                                       tk_max=128)
    jax.block_until_ready(out3)
    assert out3.shape == (bs3, lq3, dm3)
    assert attn3.shape == (bs3, h3, lq3, lk3)
    assert jnp.allclose(out3, out3_ref, atol=5e-2, rtol=5e-2)
    assert jnp.allclose(attn3, attn3_ref, atol=5e-3, rtol=5e-2)

    out3f, _ = multi_head_attention(q3, k3, v3, wq3, wk3, wv3, wfc3,
                                    n_head=h3, d_k=dk3, d_v=dv3,
                                    return_attn=False, tq_max=128, tk_max=128)
    jax.block_until_ready(out3f)
    assert jnp.allclose(out3f, out3_ref, atol=5e-2, rtol=5e-2)

    print("KERNEL_OK")
</pallas_src>

<mosaic_0001>
module attributes {stable_mosaic.version = 11 : i64} {
  func.func @_mha_attn_kernel(%arg0: i32, %arg1: i32, %arg2: i32, %arg3: memref<1x8x32xbf16, #tpu.memory_space<vmem>>, %arg4: memref<1x8x32xbf16, #tpu.memory_space<vmem>>, %arg5: memref<1x8x32xbf16, #tpu.memory_space<vmem>>, %arg6: memref<32x128xbf16, #tpu.memory_space<vmem>>, %arg7: memref<32x512xbf16, #tpu.memory_space<vmem>>, %arg8: memref<32x512xbf16, #tpu.memory_space<vmem>>, %arg9: memref<128x32xbf16, #tpu.memory_space<vmem>>, %arg10: memref<1x8x32xf32, #tpu.memory_space<vmem>>, %arg11: memref<1x1x8x8xf32, #tpu.memory_space<vmem>>, %arg12: memref<4x8x128xbf16, #tpu.memory_space<vmem>>, %arg13: memref<4x8x128xbf16, #tpu.memory_space<vmem>>, %arg14: memref<8x32xf32, #tpu.memory_space<vmem>>) attributes {dimension_semantics = [#tpu.dimension_semantics<parallel>, #tpu.dimension_semantics<arbitrary>, #tpu.dimension_semantics<arbitrary>], iteration_bounds = array<i64: 2, 1, 4>, scalar_prefetch = 0 : i64, scratch_operands = 3 : i64, tpu.core_type = #tpu.core_type<tc>, window_params = [{transform_indices = @transform_0, window_bounds = array<i64: 1, 8, 32>}, {transform_indices = @transform_1, window_bounds = array<i64: 1, 8, 32>}, {transform_indices = @transform_2, window_bounds = array<i64: 1, 8, 32>}, {transform_indices = @transform_3, window_bounds = array<i64: 32, 128>}, {pipeline_mode = #tpu.pipeline_mode<synchronous>, transform_indices = @transform_4, window_bounds = array<i64: 32, 512>}, {pipeline_mode = #tpu.pipeline_mode<synchronous>, transform_indices = @transform_5, window_bounds = array<i64: 32, 512>}, {transform_indices = @transform_6, window_bounds = array<i64: 128, 32>}, {transform_indices = @transform_7, window_bounds = array<i64: 1, 8, 32>}, {transform_indices = @transform_8, window_bounds = array<i64: 1, 1, 8, 8>}]} {
    %c0_i32 = arith.constant 0 : i32
    %0 = arith.cmpi eq, %arg1, %c0_i32 : i32
    %c0_i32_0 = arith.constant 0 : i32
    %1 = arith.cmpi eq, %arg2, %c0_i32_0 : i32
    %2 = arith.andi %0, %1 : i1
    %3 = arith.extui %2 : i1 to i32
    %c0_i32_1 = arith.constant 0 : i32
    %4 = arith.cmpi ne, %3, %c0_i32_1 : i32
    scf.if %4 {
      %c0_28 = arith.constant 0 : index
      %c0_29 = arith.constant 0 : index
      %c0_30 = arith.constant 0 : index
      %44 = vector.load %arg4[%c0_28, %c0_29, %c0_30] : memref<1x8x32xbf16, #tpu.memory_space<vmem>>, vector<1x8x32xbf16>
      %45 = vector.shape_cast %44 : vector<1x8x32xbf16> to vector<8x32xbf16>
      %c0_31 = arith.constant 0 : index
      %c0_32 = arith.constant 0 : index
      %c0_33 = arith.constant 0 : index
      %46 = vector.load %arg5[%c0_31, %c0_32, %c0_33] : memref<1x8x32xbf16, #tpu.memory_space<vmem>>, vector<1x8x32xbf16>
      %47 = vector.shape_cast %46 : vector<1x8x32xbf16> to vector<8x32xbf16>
      %c0_34 = arith.constant 0 : index
      %c0_35 = arith.constant 0 : index
      %48 = vector.load %arg7[%c0_34, %c0_35] : memref<32x512xbf16, #tpu.memory_space<vmem>>, vector<32x128xbf16>
      %cst_36 = arith.constant dense<0.000000e+00> : vector<8x128xf32>
      %49 = tpu.matmul %45, %48, %cst_36 {dimension_numbers = #tpu.dot_dimension_numbers<[1], [0], [0], [1], [0, 0, 1, 1], [], []>} : vector<8x32xbf16>, vector<32x128xbf16>, vector<8x128xf32> -> vector<8x128xf32>
      %50 = arith.truncf %49 : vector<8x128xf32> to vector<8x128xbf16>
      %c0_37 = arith.constant 0 : index
      %c0_38 = arith.constant 0 : index
      %c0_39 = arith.constant 0 : index
      %51 = vector.load %arg12[%c0_37, %c0_38, %c0_39] : memref<4x8x128xbf16, #tpu.memory_space<vmem>>, vector<1x8x128xbf16>
      %52 = vector.shape_cast %51 : vector<1x8x128xbf16> to vector<8x128xbf16>
      %53 = vector.shape_cast %50 : vector<8x128xbf16> to vector<1x8x128xbf16>
      tpu.vector_store %arg12[%c0_37, %c0_38, %c0_39], %53 {strides = array<i32>} : memref<4x8x128xbf16, #tpu.memory_space<vmem>>, vector<1x8x128xbf16>,
      %c0_40 = arith.constant 0 : index
      %c0_41 = arith.constant 0 : index
      %54 = vector.load %arg8[%c0_40, %c0_41] : memref<32x512xbf16, #tpu.memory_space<vmem>>, vector<32x128xbf16>
      %cst_42 = arith.constant dense<0.000000e+00> : vector<8x128xf32>
      %55 = tpu.matmul %47, %54, %cst_42 {dimension_numbers = #tpu.dot_dimension_numbers<[1], [0], [0], [1], [0, 0, 1, 1], [], []>} : vector<8x32xbf16>, vector<32x128xbf16>, vector<8x128xf32> -> vector<8x128xf32>
      %56 = arith.truncf %55 : vector<8x128xf32> to vector<8x128xbf16>
      %c0_43 = arith.constant 0 : index
      %c0_44 = arith.constant 0 : index
      %c0_45 = arith.constant 0 : index
      %57 = vector.load %arg13[%c0_43, %c0_44, %c0_45] : memref<4x8x128xbf16, #tpu.memory_space<vmem>>, vector<1x8x128xbf16>
      %58 = vector.shape_cast %57 : vector<1x8x128xbf16> to vector<8x128xbf16>
      %59 = vector.shape_cast %56 : vector<8x128xbf16> to vector<1x8x128xbf16>
      tpu.vector_store %arg13[%c0_43, %c0_44, %c0_45], %59 {strides = array<i32>} : memref<4x8x128xbf16, #tpu.memory_space<vmem>>, vector<1x8x128xbf16>,
      %c0_46 = arith.constant 0 : index
      %c128 = arith.constant 128 : index
      %60 = vector.load %arg7[%c0_46, %c128] : memref<32x512xbf16, #tpu.memory_space<vmem>>, vector<32x128xbf16>
      %cst_47 = arith.constant dense<0.000000e+00> : vector<8x128xf32>
      %61 = tpu.matmul %45, %60, %cst_47 {dimension_numbers = #tpu.dot_dimension_numbers<[1], [0], [0], [1], [0, 0, 1, 1], [], []>} : vector<8x32xbf16>, vector<32x128xbf16>, vector<8x128xf32> -> vector<8x128xf32>
      %62 = arith.truncf %61 : vector<8x128xf32> to vector<8x128xbf16>
      %c1 = arith.constant 1 : index
      %c0_48 = arith.constant 0 : index
      %c0_49 = arith.constant 0 : index
      %63 = vector.load %arg12[%c1, %c0_48, %c0_49] : memref<4x8x128xbf16, #tpu.memory_space<vmem>>, vector<1x8x128xbf16>
      %64 = vector.shape_cast %63 : vector<1x8x128xbf16> to vector<8x128xbf16>
      %65 = vector.shape_cast %62 : vector<8x128xbf16> to vector<1x8x128xbf16>
      tpu.vector_store %arg12[%c1, %c0_48, %c0_49], %65 {strides = array<i32>} : memref<4x8x128xbf16, #tpu.memory_space<vmem>>, vector<1x8x128xbf16>,
      %c0_50 = arith.constant 0 : index
      %c128_51 = arith.constant 128 : index
      %66 = vector.load %arg8[%c0_50, %c128_51] : memref<32x512xbf16, #tpu.memory_space<vmem>>, vector<32x128xbf16>
      %cst_52 = arith.constant dense<0.000000e+00> : vector<8x128xf32>
      %67 = tpu.matmul %47, %66, %cst_52 {dimension_numbers = #tpu.dot_dimension_numbers<[1], [0], [0], [1], [0, 0, 1, 1], [], []>} : vector<8x32xbf16>, vector<32x128xbf16>, vector<8x128xf32> -> vector<8x128xf32>
      %68 = arith.truncf %67 : vector<8x128xf32> to vector<8x128xbf16>
      %c1_53 = arith.constant 1 : index
      %c0_54 = arith.constant 0 : index
      %c0_55 = arith.constant 0 : index
      %69 = vector.load %arg13[%c1_53, %c0_54, %c0_55] : memref<4x8x128xbf16, #tpu.memory_space<vmem>>, vector<1x8x128xbf16>
      %70 = vector.shape_cast %69 : vector<1x8x128xbf16> to vector<8x128xbf16>
      %71 = vector.shape_cast %68 : vector<8x128xbf16> to vector<1x8x128xbf16>
      tpu.vector_store %arg13[%c1_53, %c0_54, %c0_55], %71 {strides = array<i32>} : memref<4x8x128xbf16, #tpu.memory_space<vmem>>, vector<1x8x128xbf16>,
      %c0_56 = arith.constant 0 : index
      %c256 = arith.constant 256 : index
      %72 = vector.load %arg7[%c0_56, %c256] : memref<32x512xbf16, #tpu.memory_space<vmem>>, vector<32x128xbf16>
      %cst_57 = arith.constant dense<0.000000e+00> : vector<8x128xf32>
      %73 = tpu.matmul %45, %72, %cst_57 {dimension_numbers = #tpu.dot_dimension_numbers<[1], [0], [0], [1], [0, 0, 1, 1], [], []>} : vector<8x32xbf16>, vector<32x128xbf16>, vector<8x128xf32> -> vector<8x128xf32>
      %74 = arith.truncf %73 : vector<8x128xf32> to vector<8x128xbf16>
      %c2 = arith.constant 2 : index
      %c0_58 = arith.constant 0 : index
      %c0_59 = arith.constant 0 : index
      %75 = vector.load %arg12[%c2, %c0_58, %c0_59] : memref<4x8x128xbf16, #tpu.memory_space<vmem>>, vector<1x8x128xbf16>
      %76 = vector.shape_cast %75 : vector<1x8x128xbf16> to vector<8x128xbf16>
      %77 = vector.shape_cast %74 : vector<8x128xbf16> to vector<1x8x128xbf16>
      tpu.vector_store %arg12[%c2, %c0_58, %c0_59], %77 {strides = array<i32>} : memref<4x8x128xbf16, #tpu.memory_space<vmem>>, vector<1x8x128xbf16>,
      %c0_60 = arith.constant 0 : index
      %c256_61 = arith.constant 256 : index
      %78 = vector.load %arg8[%c0_60, %c256_61] : memref<32x512xbf16, #tpu.memory_space<vmem>>, vector<32x128xbf16>
      %cst_62 = arith.constant dense<0.000000e+00> : vector<8x128xf32>
      %79 = tpu.matmul %47, %78, %cst_62 {dimension_numbers = #tpu.dot_dimension_numbers<[1], [0], [0], [1], [0, 0, 1, 1], [], []>} : vector<8x32xbf16>, vector<32x128xbf16>, vector<8x128xf32> -> vector<8x128xf32>
      %80 = arith.truncf %79 : vector<8x128xf32> to vector<8x128xbf16>
      %c2_63 = arith.constant 2 : index
      %c0_64 = arith.constant 0 : index
      %c0_65 = arith.constant 0 : index
      %81 = vector.load %arg13[%c2_63, %c0_64, %c0_65] : memref<4x8x128xbf16, #tpu.memory_space<vmem>>, vector<1x8x128xbf16>
      %82 = vector.shape_cast %81 : vector<1x8x128xbf16> to vector<8x128xbf16>
      %83 = vector.shape_cast %80 : vector<8x128xbf16> to vector<1x8x128xbf16>
      tpu.vector_store %arg13[%c2_63, %c0_64, %c0_65], %83 {strides = array<i32>} : memref<4x8x128xbf16, #tpu.memory_space<vmem>>, vector<1x8x128xbf16>,
      %c0_66 = arith.constant 0 : index
      %c384 = arith.constant 384 : index
      %84 = vector.load %arg7[%c0_66, %c384] : memref<32x512xbf16, #tpu.memory_space<vmem>>, vector<32x128xbf16>
      %cst_67 = arith.constant dense<0.000000e+00> : vector<8x128xf32>
      %85 = tpu.matmul %45, %84, %cst_67 {dimension_numbers = #tpu.dot_dimension_numbers<[1], [0], [0], [1], [0, 0, 1, 1], [], []>} : vector<8x32xbf16>, vector<32x128xbf16>, vector<8x128xf32> -> vector<8x128xf32>
      %86 = arith.truncf %85 : vector<8x128xf32> to vector<8x128xbf16>
      %c3 = arith.constant 3 : index
      %c0_68 = arith.constant 0 : index
      %c0_69 = arith.constant 0 : index
      %87 = vector.load %arg12[%c3, %c0_68, %c0_69] : memref<4x8x128xbf16, #tpu.memory_space<vmem>>, vector<1x8x128xbf16>
      %88 = vector.shape_cast %87 : vector<1x8x128xbf16> to vector<8x128xbf16>
      %89 = vector.shape_cast %86 : vector<8x128xbf16> to vector<1x8x128xbf16>
      tpu.vector_store %arg12[%c3, %c0_68, %c0_69], %89 {strides = array<i32>} : memref<4x8x128xbf16, #tpu.memory_space<vmem>>, vector<1x8x128xbf16>,
      %c0_70 = arith.constant 0 : index
      %c384_71 = arith.constant 384 : index
      %90 = vector.load %arg8[%c0_70, %c384_71] : memref<32x512xbf16, #tpu.memory_space<vmem>>, vector<32x128xbf16>
      %cst_72 = arith.constant dense<0.000000e+00> : vector<8x128xf32>
      %91 = tpu.matmul %47, %90, %cst_72 {dimension_numbers = #tpu.dot_dimension_numbers<[1], [0], [0], [1], [0, 0, 1, 1], [], []>} : vector<8x32xbf16>, vector<32x128xbf16>, vector<8x128xf32> -> vector<8x128xf32>
      %92 = arith.truncf %91 : vector<8x128xf32> to vector<8x128xbf16>
      %c3_73 = arith.constant 3 : index
      %c0_74 = arith.constant 0 : index
      %c0_75 = arith.constant 0 : index
      %93 = vector.load %arg13[%c3_73, %c0_74, %c0_75] : memref<4x8x128xbf16, #tpu.memory_space<vmem>>, vector<1x8x128xbf16>
      %94 = vector.shape_cast %93 : vector<1x8x128xbf16> to vector<8x128xbf16>
      %95 = vector.shape_cast %92 : vector<8x128xbf16> to vector<1x8x128xbf16>
      tpu.vector_store %arg13[%c3_73, %c0_74, %c0_75], %95 {strides = array<i32>} : memref<4x8x128xbf16, #tpu.memory_space<vmem>>, vector<1x8x128xbf16>,
    } else {
    }
    %c0_i32_2 = arith.constant 0 : i32
    %5 = arith.cmpi eq, %arg2, %c0_i32_2 : i32
    %6 = arith.extui %5 : i1 to i32
    %c0_i32_3 = arith.constant 0 : i32
    %7 = arith.cmpi ne, %6, %c0_i32_3 : i32
    scf.if %7 {
      %cst_28 = arith.constant 0.000000e+00 : f32
      %44 = vector.broadcast %cst_28 : f32 to vector<8x32xf32>
      %c0_29 = arith.constant 0 : index
      %c0_30 = arith.constant 0 : index
      %45 = vector.load %arg14[%c0_29, %c0_30] : memref<8x32xf32, #tpu.memory_space<vmem>>, vector<8x32xf32>
      tpu.vector_store %arg14[%c0_29, %c0_30], %44 {strides = array<i32>} : memref<8x32xf32, #tpu.memory_space<vmem>>, vector<8x32xf32>,
    } else {
    }
    %c0 = arith.constant 0 : index
    %c0_4 = arith.constant 0 : index
    %c0_5 = arith.constant 0 : index
    %8 = vector.load %arg3[%c0, %c0_4, %c0_5] : memref<1x8x32xbf16, #tpu.memory_space<vmem>>, vector<1x8x32xbf16>
    %9 = vector.shape_cast %8 : vector<1x8x32xbf16> to vector<8x32xbf16>
    %c0_6 = arith.constant 0 : index
    %c0_7 = arith.constant 0 : index
    %10 = vector.load %arg6[%c0_6, %c0_7] : memref<32x128xbf16, #tpu.memory_space<vmem>>, vector<32x128xbf16>
    %cst = arith.constant dense<0.000000e+00> : vector<8x128xf32>
    %11 = tpu.matmul %9, %10, %cst {dimension_numbers = #tpu.dot_dimension_numbers<[1], [0], [0], [1], [0, 0, 1, 1], [], []>} : vector<8x32xbf16>, vector<32x128xbf16>, vector<8x128xf32> -> vector<8x128xf32>
    %12 = arith.truncf %11 : vector<8x128xf32> to vector<8x128xbf16>
    %13 = arith.index_cast %arg2 : i32 to index
    %c0_8 = arith.constant 0 : index
    %c0_9 = arith.constant 0 : index
    %14 = vector.load %arg12[%13, %c0_8, %c0_9] : memref<4x8x128xbf16, #tpu.memory_space<vmem>>, vector<1x8x128xbf16>
    %15 = vector.shape_cast %14 : vector<1x8x128xbf16> to vector<8x128xbf16>
    %16 = arith.index_cast %arg2 : i32 to index
    %c0_10 = arith.constant 0 : index
    %c0_11 = arith.constant 0 : index
    %17 = vector.load %arg13[%16, %c0_10, %c0_11] : memref<4x8x128xbf16, #tpu.memory_space<vmem>>, vector<1x8x128xbf16>
    %18 = vector.shape_cast %17 : vector<1x8x128xbf16> to vector<8x128xbf16>
    %cst_12 = arith.constant dense<0.000000e+00> : vector<8x8xf32>
    %19 = tpu.matmul %12, %15, %cst_12 {dimension_numbers = #tpu.dot_dimension_numbers<[1], [1], [0], [0], [0, 0, 1, 0], [], []>} : vector<8x128xbf16>, vector<8x128xbf16>, vector<8x8xf32> -> vector<8x8xf32>
    %cst_13 = arith.constant dense<0xFF800000> : vector<8xf32>
    %20 = vector.multi_reduction <maximumf>, %19, %cst_13 [1] : vector<8x8xf32> to vector<8xf32>
    %21 = vector.shape_cast %20 : vector<8xf32> to vector<8x1xf32>
    %22 = vector.broadcast %21 : vector<8x1xf32> to vector<8x8xf32>
    %23 = arith.subf %19, %22 : vector<8x8xf32>
    %24 = math.exp %23 : vector<8x8xf32>
    %cst_14 = arith.constant dense<0.000000e+00> : vector<8xf32>
    %25 = vector.multi_reduction <add>, %24, %cst_14 [1] : vector<8x8xf32> to vector<8xf32>
    %26 = vector.shape_cast %25 : vector<8xf32> to vector<8x1xf32>
    %27 = tpu.reciprocal %26 {approx = true} : vector<8x1xf32> -> vector<8x1xf32>
    %28 = vector.broadcast %27 : vector<8x1xf32> to vector<8x8xf32>
    %29 = arith.mulf %24, %28 : vector<8x8xf32>
    %c0_15 = arith.constant 0 : index
    %c0_16 = arith.constant 0 : index
    %c0_17 = arith.constant 0 : index
    %c0_18 = arith.constant 0 : index
    %30 = vector.load %arg11[%c0_15, %c0_16, %c0_17, %c0_18] : memref<1x1x8x8xf32, #tpu.memory_space<vmem>>, vector<1x1x8x8xf32>
    %31 = vector.shape_cast %30 : vector<1x1x8x8xf32> to vector<8x8xf32>
    %32 = vector.shape_cast %29 : vector<8x8xf32> to vector<1x1x8x8xf32>
    tpu.vector_store %arg11[%c0_15, %c0_16, %c0_17, %c0_18], %32 {strides = array<i32>} : memref<1x1x8x8xf32, #tpu.memory_space<vmem>>, vector<1x1x8x8xf32>,
    %33 = arith.truncf %29 : vector<8x8xf32> to vector<8x8xbf16>
    %cst_19 = arith.constant dense<0.000000e+00> : vector<8x128xf32>
    %34 = tpu.matmul %33, %18, %cst_19 {dimension_numbers = #tpu.dot_dimension_numbers<[1], [0], [0], [1], [0, 0, 1, 1], [], []>} : vector<8x8xbf16>, vector<8x128xbf16>, vector<8x128xf32> -> vector<8x128xf32>
    %c0_20 = arith.constant 0 : index
    %c0_21 = arith.constant 0 : index
    %35 = vector.load %arg14[%c0_20, %c0_21] : memref<8x32xf32, #tpu.memory_space<vmem>>, vector<8x32xf32>
    %36 = arith.truncf %34 : vector<8x128xf32> to vector<8x128xbf16>
    %c0_22 = arith.constant 0 : index
    %c0_23 = arith.constant 0 : index
    %37 = vector.load %arg9[%c0_22, %c0_23] : memref<128x32xbf16, #tpu.memory_space<vmem>>, vector<128x32xbf16>
    %cst_24 = arith.constant dense<0.000000e+00> : vector<8x32xf32>
    %38 = tpu.matmul %36, %37, %cst_24 {dimension_numbers = #tpu.dot_dimension_numbers<[1], [0], [0], [1], [0, 0, 1, 1], [], []>} : vector<8x128xbf16>, vector<128x32xbf16>, vector<8x32xf32> -> vector<8x32xf32>
    %39 = arith.addf %35, %38 : vector<8x32xf32>
    %c0_25 = arith.constant 0 : index
    %c0_26 = arith.constant 0 : index
    %40 = vector.load %arg14[%c0_25, %c0_26] : memref<8x32xf32, #tpu.memory_space<vmem>>, vector<8x32xf32>
    tpu.vector_store %arg14[%c0_25, %c0_26], %39 {strides = array<i32>} : memref<8x32xf32, #tpu.memory_space<vmem>>, vector<8x32xf32>,
    %c3_i32 = arith.constant 3 : i32
    %41 = arith.cmpi eq, %arg2, %c3_i32 : i32
    %42 = arith.extui %41 : i1 to i32
    %c0_i32_27 = arith.constant 0 : i32
    %43 = arith.cmpi ne, %42, %c0_i32_27 : i32
    scf.if %43 {
      %c0_28 = arith.constant 0 : index
      %c0_29 = arith.constant 0 : index
      %44 = vector.load %arg14[%c0_28, %c0_29] : memref<8x32xf32, #tpu.memory_space<vmem>>, vector<8x32xf32>
      %c0_30 = arith.constant 0 : index
      %c0_31 = arith.constant 0 : index
      %c0_32 = arith.constant 0 : index
      %45 = vector.load %arg10[%c0_30, %c0_31, %c0_32] : memref<1x8x32xf32, #tpu.memory_space<vmem>>, vector<1x8x32xf32>
      %46 = vector.shape_cast %45 : vector<1x8x32xf32> to vector<8x32xf32>
      %47 = vector.shape_cast %44 : vector<8x32xf32> to vector<1x8x32xf32>
      tpu.vector_store %arg10[%c0_30, %c0_31, %c0_32], %47 {strides = array<i32>} : memref<1x8x32xf32, #tpu.memory_space<vmem>>, vector<1x8x32xf32>,
    } else {
    }
    return
  }
  func.func @transform_0(%arg0: i32, %arg1: i32, %arg2: i32) -> (i32, i32, i32) {
    %c0_i32 = arith.constant 0 : i32
    %c0_i32_0 = arith.constant 0 : i32
    return %arg0, %arg1, %c0_i32 : i32, i32, i32
  }
  func.func @transform_1(%arg0: i32, %arg1: i32, %arg2: i32) -> (i32, i32, i32) {
    %c0_i32 = arith.constant 0 : i32
    %c0_i32_0 = arith.constant 0 : i32
    %c0_i32_1 = arith.constant 0 : i32
    return %arg0, %c0_i32, %c0_i32_0 : i32, i32, i32
  }
  func.func @transform_2(%arg0: i32, %arg1: i32, %arg2: i32) -> (i32, i32, i32) {
    %c0_i32 = arith.constant 0 : i32
    %c0_i32_0 = arith.constant 0 : i32
    %c0_i32_1 = arith.constant 0 : i32
    return %arg0, %c0_i32, %c0_i32_0 : i32, i32, i32
  }
  func.func @transform_3(%arg0: i32, %arg1: i32, %arg2: i32) -> (i32, i32) {
    %c0_i32 = arith.constant 0 : i32
    %c0_i32_0 = arith.constant 0 : i32
    return %c0_i32, %arg2 : i32, i32
  }
  func.func @transform_4(%arg0: i32, %arg1: i32, %arg2: i32) -> (i32, i32) {
    %c0_i32 = arith.constant 0 : i32
    %c0_i32_0 = arith.constant 0 : i32
    %c0_i32_1 = arith.constant 0 : i32
    return %c0_i32, %c0_i32_0 : i32, i32
  }
  func.func @transform_5(%arg0: i32, %arg1: i32, %arg2: i32) -> (i32, i32) {
    %c0_i32 = arith.constant 0 : i32
    %c0_i32_0 = arith.constant 0 : i32
    %c0_i32_1 = arith.constant 0 : i32
    return %c0_i32, %c0_i32_0 : i32, i32
  }
  func.func @transform_6(%arg0: i32, %arg1: i32, %arg2: i32) -> (i32, i32) {
    %c0_i32 = arith.constant 0 : i32
    %c0_i32_0 = arith.constant 0 : i32
    return %arg2, %c0_i32 : i32, i32
  }
  func.func @transform_7(%arg0: i32, %arg1: i32, %arg2: i32) -> (i32, i32, i32) {
    %c0_i32 = arith.constant 0 : i32
    %c0_i32_0 = arith.constant 0 : i32
    return %arg0, %arg1, %c0_i32 : i32, i32, i32
  }
  func.func @transform_8(%arg0: i32, %arg1: i32, %arg2: i32) -> (i32, i32, i32, i32) {
    %c0_i32 = arith.constant 0 : i32
    %c0_i32_0 = arith.constant 0 : i32
    return %arg0, %arg2, %arg1, %c0_i32 : i32, i32, i32, i32
  }
}

</mosaic_0001>

<bundles_post_ra>
// kernel: tpu_custom_call.1
= control target key start
LH: loop header
LB: loop body
LE: loop exit
PB: predicated region body
PF: predicated region fallthrough
CT: control target
= control target key end

     0   :  { %s2448_s0 = inlined_call_operand.vmem [shape: bf16[2,8,32], index: 0, kind: input, shape index: {}]   ;;  %s2449_s1 = inlined_call_operand.vmem [shape: bf16[2,8,32], index: 1, kind: input, shape index: {}]   ;;  %s2450_s2 = inlined_call_operand.vmem [shape: bf16[2,8,32], index: 2, kind: input, shape index: {}]   ;;  %s2451_s3 = inlined_call_operand.vmem [shape: bf16[32,512], index: 3, kind: input, shape index: {}]   ;;  %s2452_s4 = inlined_call_operand.vmem [shape: bf16[32,512], index: 4, kind: input, shape index: {}]   ;;  %s2453_s5 = inlined_call_operand.vmem [shape: bf16[32,512], index: 5, kind: input, shape index: {}]   ;;  %s2454_s6 = inlined_call_operand.vmem [shape: bf16[512,32], index: 6, kind: input, shape index: {}]   ;;  %s2455_s7 = inlined_call_operand.hbm [shape: f32[2,8,32], index: 7, kind: output, shape index: {0}]   ;;  %s2456_s8 = inlined_call_operand.hbm [shape: f32[2,4,8,8], index: 8, kind: output, shape index: {1}]  }
   0x1   :  { %2477 = sst [smem:[#allocation28_spill]] %s2451_s3 }
   0x2   :  { %2478 = sst [smem:[#allocation29_spill]] %s2453_s5 }
   0x3   :  { %2479 = sst [smem:[#allocation30_spill]] %s2455_s7 }
   0x4   :  { %2480 = sst [smem:[#allocation31_spill]] %s2456_s8 }
   0x5   :  { %14 = vsyncpa [#allocation7], 0 }
   0x6   :  { %16 = vsyncpa [#allocation7 + $0x1], 0 }
   0x7   :  { %17 = vsyncpa [#allocation9], 0 }
   0x8   :  { %19 = vsyncpa [#allocation9 + $0x1], 0  ;;  %s2034_s27 = smov 0   ;;  %s2036_s28 = smov 0  }
   0x9   :  { %s2038_s29 = smov 0   ;;  %s2040_s30 = smov 0  }
   0xa   :  { %s2042_s9 = smov 0   ;;  %s2044_s10 = smov 0  }
   0xb   :  { %s2046_s11 = smov 0   ;;  %s2048_s12 = smov 0  }
   0xc   :  { %s2050_s13 = smov 0   ;;  %s2052_s14 = smov 0  }
   0xd   :  { %s2054_s15 = smov 0   ;;  %s2056_s16 = smov 0  }
   0xe   :  { %s2058_s17 = smov 0  }
   0xf LB: > { %2481 = sst [smem:[#allocation12_spill]] %s1932_s27  ;;  %s1459_s18 = sadd.s32 4294967295, %s1980_s17   ;;  %s1980_s17 = sphi %s2058_s17, %s25_s17   ;;  %s1976_s16 = sphi %s2056_s16, %s2528_s16   ;;  %s1972_s15 = sphi %s2054_s15, %s2527_s15   ;;  %s1968_s14 = sphi %s2052_s14, %s2526_s14   ;;  %s1964_s13 = sphi %s2050_s13, %s2525_s13   ;;  %s1960_s12 = sphi %s2048_s12, %s2524_s12   ;;  %s1956_s11 = sphi %s2046_s11, %s2523_s11   ;;  %s1952_s10 = sphi %s2044_s10, %s2533_s10   ;;  %s1948_s9 = sphi %s2042_s9, %s2532_s9   ;;  %s1944_s30 = sphi %s2040_s30, %s2531_s30   ;;  %s1940_s29 = sphi %s2038_s29, %s2520_s29   ;;  %s1936_s28 = sphi %s2036_s28, %s2530_s28   ;;  %s1932_s27 = sphi %s2034_s27, %s2529_s27  }
  0x10   : > { %2482 = sst [smem:[#allocation13_spill]] %s1940_s29  ;;  %s1460_s19 = sadd.s32 4294967294, %s1980_s17  }
  0x11   : > { %2483 = sst [smem:[#allocation14_spill]] %s1944_s30  ;;  %s37_s20 = sadd.s32 1, %s1972_s15 }
  0x12   : > { %2484 = sst [smem:[#allocation15_spill]] %s1952_s10  ;;  %s44_s21 = sadd.s32 1, %s1976_s16 }
  0x13   : > { %2485 = sst [smem:[#allocation16_spill]] %s1960_s12  ;;  %p38_p0 = scmp.ge.s32.totalorder %s37_s20, 4 }
  0x14   : > { %2486 = sst [smem:[#allocation17_spill]] %s1972_s15  ;;  %s131_s22 = sadd.s32 1, %s1960_s12 }
  0x15   : > { %2487 = sst [smem:[#allocation18_spill]] %s1976_s16  ;;  %p138_p1 = scmp.ne.s32.totalorder %s1960_s12, %s1956_s11 }
  0x16   : > { %2488 = sst [smem:[#allocation19_spill]] %s1980_s17  ;;  %p139_p2 = scmp.eq.s32.totalorder %s1980_s17, 0 }
  0x17   : > { %s2535_s20 = smov (%p38_p0, %s37_s20), 0  ;;  %s2537_s21 = smov (!%p38_p0, %s44_s21), %s1976_s16 }
  0x18   : > { %2489 = sst [smem:[#allocation20_spill]] %s2535_s20  ;;  %s128_s23 = ssub.s32 %s1972_s15, %s2535_s20 }
  0x19   : > { %p2112_p3 = por %p139_p2, %p138_p1  ;;  %p46_p4 = scmp.ge.s32.totalorder %s2537_s21, 2 }
  0x1a   : > { %p129_p5 = scmp.eq.s32.totalorder %s128_s23, 0  ;;  %s227_s25 = sadd.s32 1, %s1952_s10 }
  0x1b   : > { %p237_p6 = scmp.ne.s32.totalorder %s1952_s10, %s1948_s9  ;;  %s2539_s21 = smov (%p46_p4, %s2537_s21), 0 }
  0x1c   : > { %2491 = sst [smem:[#allocation21_spill]] %s2539_s21  ;;  %s222_s20 = ssub.s32 %s1976_s16, %s2539_s21 }
  0x1d   : > { %s2122_s26 = scalar_select %p129_p5, %s1960_s12, %s131_s22  }
  0x1e   : > { %p2126_p7 = scmp.eq.s32.totalorder %s1459_s18, 7  ;;  %p225_p8 = scmp.eq.s32.totalorder %s222_s20, 0 }
  0x1f   : > { %2492 = sst [smem:[#allocation22_spill]] %s2122_s26  ;;  %p243_p9 = scmp.ne.s32.totalorder %s1948_s9, %s1944_s30 }
  0x20   : > { %p2134_p10 = por %p2126_p7, %p237_p6  ;;  %p244_p11 = scmp.eq.s32.totalorder %s1460_s19, 7 }
  0x21   : > { %s2139_s5 = scalar_select %p225_p8, %s1952_s10, %s227_s25  }
  0x22   : > { %p2141_p12 = por %p244_p11, %p243_p9  ;;  %s252_s18 = sor.u32 %s222_s20, %s128_s23 }
  0x23   : > { %2495 = sst [smem:[#allocation23_spill]] %s2139_s5  ;;  %p255_p13 = scmp.eq.s32.totalorder %s252_s18, 0 }
  0x24   : > { %s2496_s22 = scalar_select %p2141_p12, 1, 0 }
  0x25   : > { %s257_s21 = sadd.s32 1, %s1940_s29  ;;  %p267_p0 = scmp.ne.s32.totalorder %s1940_s29, %s1936_s28 }
  0x26   : > { %2497 = sst [smem:[#allocation24_spill]] %s2496_s22  ;;  %p273_p1 = scmp.ne.s32.totalorder %s1936_s28, %s1932_s27 }
  0x27   : > { %s2151_s16 = scalar_select %p255_p13, %s1940_s29, %s257_s21  }
  0x28   : > { %p2155_p2 = por %p267_p0, %p2126_p7  ;;  %p2159_p4 = por %p273_p1, %p244_p11 }
  0x29   : > { %2498 = sst [smem:[#allocation25_spill]] %s2151_s16  ;;  %p1462_p5 = scmp.ge.s32.totalorder %s1980_s17, 8 }
  0x2a   : > { %s2499_s26 = scalar_select %p2155_p2, 1, 0 }
  0x2b   : > { %s2501_s19 = scalar_select %p2159_p4, 1, 0 }
  0x2c   : > { %2500 = sst [smem:[#allocation26_spill]] %s2499_s26  ;;  %296 = sbr.rel (%p1462_p5) target bundleno = 62 (0x3e), region = 24 }
  0x2d   : > { %2502 = sst [smem:[#allocation27_spill]] %s2501_s19 }
  0x31   : > { %323 = sbr.rel (!%p2112_p3) target bundleno = 62 (0x3e), region = 40  ;;  %s325_s20 = sand.u32 (%p2112_p3), 1, %s1960_s12  }
  0x32   : > { %s1464_s21 = sshll.u32 (%p2112_p3), %s1972_s15, 2  ;;  %s1463_s23 = sshll.u32 (%p2112_p3), %s325_s20, 4 }
  0x33   : > { %s2503_s3 = sld [smem:[#allocation28_spill]] (%p2112_p3)  ;;  %s327_s5 = scalar_lea.vmem (%p2112_p3), [#allocation5], %s1463_s23 }
  0x39   : > { %s329_s18 = scalar_lea.vmem %s2503_s3, %s1464_s21 }
  0x3a   : > { %v346_v0 = vld [vmem:[%s329_s18] sm:$0xf]  ;;  %v348_v1 = vld [vmem:[%s329_s18 + $0x10] sm:$0xf] }
  0x3b   : > { %347 = vst [vmem:[%s327_s5] sm:$0xf] %v346_v0  ;;  %349 = vst [vmem:[%s327_s5 + $0x4] sm:$0xf] %v348_v1  ;;  %v350_v2 = vld [vmem:[%s329_s18 + $0x20] sm:$0xf] }
  0x3c   : > { %v352_v3 = vld [vmem:[%s329_s18 + $0x30] sm:$0xf]  ;;  %351 = vst [vmem:[%s327_s5 + $0x8] sm:$0xf] %v350_v2 }
  0x3d   : > { %353 = vst [vmem:[%s327_s5 + $0xc] sm:$0xf] %v352_v3 }
  0x3e PF: > { %p1465_p3 = scmp.ge.s32.totalorder %s1980_s17, 1  ;;  %p393_p6 = scmp.lt.s32.totalorder %s1980_s17, 9 }
  0x40   : > { %p394_p7 = pnand %p1465_p3, %p393_p6 }
  0x41   : > { %s400_s24 = sand.u32 (!%p394_p7), 1, %s1956_s11   ;;  %s2463_s20 = sand.u32 (!%p394_p7), 1, %s1948_s9  }
  0x42   : > { %397 = sbr.rel (%p394_p7) target bundleno = 1485 (0x5cd), region = 85  ;;  %s2175_s5 = sshll.u32 (!%p394_p7), %s400_s24, 4 }
  0x43   : > { %s2179_s21 = sshll.u32 (!%p394_p7), %s2463_s20, 3  ;;  %s2466_s23 = sand.u32 (!%p394_p7), 1, %s1936_s28  }
  0x44   : > { %p458_p8 = scmp.lt.s32.totalorder (!%p394_p7), %s1968_s14, 1  ;;  %s2185_s8 = sshll.u32 (!%p394_p7), %s2466_s23, 3 }
  0x45   : > { %s1472_s25 = sshll.u32 (!%p394_p7), %s1964_s13, 4  ;;  %p481_p11 = scmp.eq.s32.totalorder (!%p394_p7), %s1964_s13, 0 }
  0x46   : > { %p474_p9 = scmp.lt.s32.totalorder (!%p394_p7), %s1472_s25, 63  ;;  %s402_s30 = scalar_lea.vmem (!%p394_p7), [#allocation5], %s2175_s5 }
  0x47   : > { %s459_s18 = scalar_select %p458_p8, %s1968_s14, 1  ;;  %v1982_v4 = vmov (%p481_p11), 0.0   ;;  %v1788_v5 = vld [vmem:[%s2452_s4 + $0x20] ss:$16 sps:$4 sm:$0xff] (%p481_p11)   ;;  %vm1983_vm0 = vmmov (%p481_p11), 0   ;;  %vm504_vm1 = vcmask (%p481_p11), 261120  }
  0x48   : > { %s2541_s25 = smov (!%p474_p9, %s1472_s25), 63  ;;  %s450_s17 = scalar_lea.vmem [#allocation6], %s2179_s21  ;;  %1563 = vmatprep.subr.bf16.mxu0 (%p481_p11), %v1982_v4  ;;  %1571 = vmatprep.subr.bf16.mxu1 (%p481_p11), %v1982_v4  ;;  %v1790_v7 = vld [vmem:[%s2452_s4] ss:$16 sps:$4 sm:$0xff] (%p481_p11)   ;;  %v1792_v11 = vld [vmem:[%s2452_s4 + $0x24] ss:$16 sps:$4 sm:$0xff] (%p481_p11)  }
  0x49   : > { %s2189_s3 = sshll.u32 %s459_s18, 2  ;;  %s1473_s19 = sshll.u32 %s2541_s25, 2  ;;  %1567 = vmatprep.mubr.msk.bf16.mxu0 (%p481_p11), %vm1983_vm0, %v1982_v4  ;;  %1575 = vmatprep.mubr.msk.bf16.mxu1 (%p481_p11), %vm1983_vm0, %v1982_v4  ;;  %v1794_v13 = vld [vmem:[%s2452_s4 + $0x4] ss:$16 sps:$4 sm:$0xff] (%p481_p11)   ;;  %v1796_v15 = vld [vmem:[%s2452_s4 + $0x28] ss:$16 sps:$4 sm:$0xff] (%p481_p11)  }
  0x4a   : > { %s464_s20 = scalar_lea.vmem %s2448_s0, %s2189_s3  ;;  %s468_s23 = scalar_lea.vmem %s2449_s1, %s2189_s3  ;;  %1564 = vmatpush3.bf16.msra.mxu0 (%p481_p11), %v1788_v5  ;;  %v1798_v17 = vld [vmem:[%s2452_s4 + $0x8] ss:$16 sps:$4 sm:$0xff] (%p481_p11)   ;;  %v1800_v19 = vld [vmem:[%s2452_s4 + $0x2c] ss:$16 sps:$4 sm:$0xff] (%p481_p11)  }
  0x4b   : > { %s472_s29 = scalar_lea.vmem %s2450_s2, %s2189_s3  ;;  %s2207_s22 = scalar_lea.vmem %s2454_s6, %s1473_s19  ;;  %1565 = vmatprep.subr.bf16.mxu0 (%p481_p11), %v1982_v4  ;;  %v486_v9 = vld [vmem:[%s468_s23] sm:$0xf] (%p481_p11)  ;;  %v1802_v21 = vld [vmem:[%s2452_s4 + $0xc] ss:$16 sps:$4 sm:$0xff] (%p481_p11)  }
  0x4c   : > { %s457_s26 = scalar_lea.vmem [#allocation8], %s2185_s8  ;;  %485 = sbr.rel (!%p481_p11) target bundleno = 314 (0x13a), region = 93  ;;  %v487_v10 = vld [vmem:[%s472_s29] sm:$0xf] (%p481_p11) }
  0x4d   : > { %s2504_s25 = sld [smem:[#allocation29_spill]] (%p481_p11) }
  0x4e   : > { %1566 = vmatpush3.bf16.msra.mxu0 (%p481_p11), %v1790_v7 }
  0x4f   : > { %1579 = vmatprep.subr.bf16.mxu0 (%p481_p11), %v1982_v4 }
  0x51   : > { %1568 = vmatmul.mubr.msk.bf16.vlgmr.msra.gmra.mxu0 %vm504_vm1, %v486_v9 }
  0x52   : > { %1580 = vmatpush3.bf16.msra.mxu0 %v1792_v11  ;;  %1583 = vmatprep.mubr.msk.bf16.mxu0 %vm1983_vm0, %v1982_v4 }
  0x53   : > { %v1789_v6 = vld [vmem:[%s2504_s25 + $0x20] ss:$16 sps:$4 sm:$0xff]   ;;  %v1793_v12 = vld [vmem:[%s2504_s25 + $0x24] ss:$16 sps:$4 sm:$0xff]   ;;  %1581 = vmatprep.subr.bf16.mxu0 %v1982_v4  ;;  %v1797_v16 = vld [vmem:[%s2504_s25 + $0x28] ss:$16 sps:$4 sm:$0xff]  }
  0x54   : > { %1572 = vmatpush3.bf16.msra.mxu1 %v1789_v6  ;;  %v1791_v8 = vld [vmem:[%s2504_s25] ss:$16 sps:$4 sm:$0xff]   ;;  %v1795_v14 = vld [vmem:[%s2504_s25 + $0x4] ss:$16 sps:$4 sm:$0xff]   ;;  %v1799_v18 = vld [vmem:[%s2504_s25 + $0x8] ss:$16 sps:$4 sm:$0xff]  }
  0x55   : > { %1573 = vmatprep.subr.bf16.mxu1 %v1982_v4  ;;  %v1801_v20 = vld [vmem:[%s2504_s25 + $0x2c] ss:$16 sps:$4 sm:$0xff]  }
  0x56   : > { %1582 = vmatpush3.bf16.msra.mxu0 %v1794_v13  ;;  %v1803_v22 = vld [vmem:[%s2504_s25 + $0xc] ss:$16 sps:$4 sm:$0xff]  }
  0x57   : > { %1595 = vmatprep.subr.bf16.mxu0 %v1982_v4 }
  0x58   : > { %1574 = vmatpush3.bf16.msra.mxu1 %v1791_v8 }
  0x59   : > { %1587 = vmatprep.subr.bf16.mxu1 %v1982_v4  ;;  %1584 = vmatmul.mubr.msk.bf16.vlgmr.msra.gmra.mxu0 %vm504_vm1, %v486_v9 }
  0x5a   : > { %1596 = vmatpush3.bf16.msra.mxu0 %v1796_v15  ;;  %1599 = vmatprep.mubr.msk.bf16.mxu0 %vm1983_vm0, %v1982_v4 }
  0x5b   : > { %1576 = vmatmul.mubr.msk.bf16.vlgmr.msra.gmra.mxu1 %vm504_vm1, %v487_v10  ;;  %1597 = vmatprep.subr.bf16.mxu0 %v1982_v4 }
  0x5c   : > { %1588 = vmatpush3.bf16.msra.mxu1 %v1793_v12  ;;  %1591 = vmatprep.mubr.msk.bf16.mxu1 %vm1983_vm0, %v1982_v4 }
  0x5d   : > { %1589 = vmatprep.subr.bf16.mxu1 %v1982_v4 }
  0x5e   : > { %1598 = vmatpush3.bf16.msra.mxu0 %v1798_v17 }
  0x5f   : > { %1611 = vmatprep.subr.bf16.mxu0 %v1982_v4 }
  0x60   : > { %1590 = vmatpush3.bf16.msra.mxu1 %v1795_v14 }
  0x61   : > { %1603 = vmatprep.subr.bf16.mxu1 %v1982_v4  ;;  %1600 = vmatmul.mubr.msk.bf16.vlgmr.msra.gmra.mxu0 %vm504_vm1, %v486_v9 }
  0x62   : > { %1612 = vmatpush3.bf16.msra.mxu0 %v1800_v19  ;;  %1615 = vmatprep.mubr.msk.bf16.mxu0 %vm1983_vm0, %v1982_v4 }
  0x63   : > { %1592 = vmatmul.mubr.msk.bf16.vlgmr.msra.gmra.mxu1 %vm504_vm1, %v487_v10  ;;  %1613 = vmatprep.subr.bf16.mxu0 %v1982_v4 }
  0x64   : > { %1604 = vmatpush3.bf16.msra.mxu1 %v1797_v16  ;;  %1607 = vmatprep.mubr.msk.bf16.mxu1 %vm1983_vm0, %v1982_v4 }
  0x65   : > { %1605 = vmatprep.subr.bf16.mxu1 %v1982_v4 }
  0x66   : > { %1614 = vmatpush3.bf16.msra.mxu0 %v1802_v21 }
  0x68   : > { %1606 = vmatpush3.bf16.msra.mxu1 %v1799_v18 }
  0x69   : > { %1619 = vmatprep.subr.bf16.mxu1 %v1982_v4  ;;  %1616 = vmatmul.mubr.msk.bf16.vlgmr.msra.gmra.mxu0 %vm504_vm1, %v486_v9 }
  0x6b   : > { %1608 = vmatmul.mubr.msk.bf16.vlgmr.msra.gmra.mxu1 %vm504_vm1, %v487_v10 }
  0x6c   : > { %1620 = vmatpush3.bf16.msra.mxu1 %v1801_v20  ;;  %1623 = vmatprep.mubr.msk.bf16.mxu1 %vm1983_vm0, %v1982_v4 }
  0x6d   : > { %1621 = vmatprep.subr.bf16.mxu1 %v1982_v4 }
  0x70   : > { %1622 = vmatpush3.bf16.msra.mxu1 %v1803_v22 }
  0x73   : > { %1624 = vmatmul.mubr.msk.bf16.vlgmr.msra.gmra.mxu1 %vm504_vm1, %v487_v10 }
 0x111   : > { %v542_v23 = vpop.f32.mrf.mxu0 }
 0x112   : > { %v548_v24 = vpack.c.bf16 %v542_v23, %v542_v23 }
 0x113   : > { %v1569_v27 = vpop.f32.mrf.mxu0 }
 0x114   : > { %549 = vst [vmem:[#allocation2] sm:$0xf] %v548_v24 }
 0x115   : > { %v545_v29 = vpop.f32.mrf.mxu0 }
 0x117   : > { %v1570_v31 = vpop.f32.mrf.mxu0 }
 0x119   : > { %v661_v33 = vpop.f32.mrf.mxu0 }
 0x11a   : > { %v667_v34 = vpack.c.bf16 %v661_v33, %v661_v33 }
 0x11b   : > { %v603_v25 = vpop.f32.mrf.mxu1  ;;  %v1585_v37 = vpop.f32.mrf.mxu0 }
 0x11c   : > { %v609_v26 = vpack.c.bf16 %v603_v25, %v603_v25  ;;  %669 = vst [vmem:[#allocation2 + $0x4] sm:$0xf] %v667_v34 }
 0x11d   : > { %v1577_v28 = vpop.f32.mrf.mxu1  ;;  %v664_v39 = vpop.f32.mrf.mxu0 }
 0x11e   : > { %610 = vst [vmem:[#allocation3] sm:$0xf] %v609_v26 }
 0x11f   : > { %v606_v30 = vpop.f32.mrf.mxu1  ;;  %v1586_v41 = vpop.f32.mrf.mxu0 }
 0x121   : > { %v1578_v32 = vpop.f32.mrf.mxu1  ;;  %v779_v43 = vpop.f32.mrf.mxu0 }
 0x122   : > { %v785_v44 = vpack.c.bf16 %v779_v43, %v779_v43 }
 0x123   : > { %v720_v35 = vpop.f32.mrf.mxu1  ;;  %v1601_v47 = vpop.f32.mrf.mxu0 }
 0x124   : > { %v726_v36 = vpack.c.bf16 %v720_v35, %v720_v35  ;;  %787 = vst [vmem:[#allocation2 + $0x8] sm:$0xf] %v785_v44 }
 0x125   : > { %v1593_v38 = vpop.f32.mrf.mxu1  ;;  %v782_v49 = vpop.f32.mrf.mxu0 }
 0x126   : > { %728 = vst [vmem:[#allocation3 + $0x4] sm:$0xf] %v726_v36 }
 0x127   : > { %v723_v40 = vpop.f32.mrf.mxu1  ;;  %v1602_v51 = vpop.f32.mrf.mxu0 }
 0x129   : > { %v1594_v42 = vpop.f32.mrf.mxu1  ;;  %v897_v53 = vpop.f32.mrf.mxu0 }
 0x12a   : > { %v903_v54 = vpack.c.bf16 %v897_v53, %v897_v53 }
 0x12b   : > { %v838_v45 = vpop.f32.mrf.mxu1  ;;  %v1617_v57 = vpop.f32.mrf.mxu0 }
 0x12c   : > { %v844_v46 = vpack.c.bf16 %v838_v45, %v838_v45  ;;  %905 = vst [vmem:[#allocation2 + $0xc] sm:$0xf] %v903_v54 }
 0x12d   : > { %v1609_v48 = vpop.f32.mrf.mxu1  ;;  %v900_v59 = vpop.f32.mrf.mxu0 }
 0x12e   : > { %846 = vst [vmem:[#allocation3 + $0x8] sm:$0xf] %v844_v46 }
 0x12f   : > { %v841_v50 = vpop.f32.mrf.mxu1  ;;  %v1618_v61 = vpop.f32.mrf.mxu0 }
 0x131   : > { %v1610_v52 = vpop.f32.mrf.mxu1 }
 0x133   : > { %v956_v55 = vpop.f32.mrf.mxu1 }
 0x134   : > { %v962_v56 = vpack.c.bf16 %v956_v55, %v956_v55 }
 0x135   : > { %v1625_v58 = vpop.f32.mrf.mxu1 }
 0x136   : > { %964 = vst [vmem:[#allocation3 + $0xc] sm:$0xf] %v962_v56 }
 0x137   : > { %v959_v60 = vpop.f32.mrf.mxu1 }
 0x139   : > { %v1626_v62 = vpop.f32.mrf.mxu1 }
 0x13a PF: > { %p1499_p13 = scmp.ne.s32.totalorder %s1964_s13, 0 }
 0x13c   : > { %967 = sbr.rel (%p1499_p13) target bundleno = 323 (0x143), region = 97 }
 0x141   : > { %vm968_vm2 = vcmask 261120   ;;  %v1984_v63 = vmov 0.0  }
 0x142   : > { %969 = vst.msk [vmem:[#allocation4] sm:$0xff] %vm968_vm2, %v1984_v63 }
 0x143 PF: > { %v1804_v0 = vld [vmem:[%s402_s30 + $0x8] sm:$0xff]   ;;  %v1985_v1 = vmov 0.0   ;;  %v1805_v2 = vld [vmem:[%s402_s30] sm:$0xff]   ;;  %vm1986_vm3 = vmmov 0   ;;  %s1503_s15 = sshll.u32 %s1964_s13, 2  ;;  %vm987_vm4 = vcmask 261120  }
 0x144   : > { %1627 = vmatprep.subr.bf16.mxu0 %v1985_v1  ;;  %1647 = vmatprep.subr.bf16.mxu1 %v1985_v1  ;;  %v970_v3 = vld [vmem:[%s464_s20] sm:$0xf]  ;;  %s1033_s23 = scalar_lea.vmem [#allocation2], %s1503_s15  ;;  %vm1078_vm5 = vcmask 64512   ;;  %s1036_s3 = scalar_lea.vmem [#allocation3], %s1503_s15  ;;  %vm1095_vm6 = vcmask 1043456  }
 0x145   : > { %1628 = vmatpush3.bf16.msra.mxu0 %v1804_v0  ;;  %1631 = vmatprep.mubr.msk.bf16.mxu0 %vm1986_vm3, %v1985_v1  ;;  %v1034_v4 = vld [vmem:[%s1033_s23] sm:$0xf]  ;;  %v1806_v22 = vld [vmem:[%s2207_s22 + $0x38] sm:$0xff]   ;;  %v1807_v23 = vld [vmem:[%s2207_s22 + $0x30] sm:$0xff]   ;;  %p1514_p0 = scmp.ne.s32.totalorder %s1964_s13, 3 }
 0x146   : > { %1629 = vmatprep.subr.bf16.mxu0 %v1985_v1  ;;  %1663 = vmatprep.mubr.msk.bf16.mxu1 %vm1986_vm3, %v1985_v1  ;;  %v1037_v20 = vld [vmem:[%s1036_s3] sm:$0xf]  ;;  %v1808_v24 = vld [vmem:[%s2207_s22 + $0x28] sm:$0xff]   ;;  %v1810_v26 = vld [vmem:[%s2207_s22 + $0x18] sm:$0xff]  }
 0x147   : > { %v1097_v21 = vsel %vm1095_vm6, %v1037_v20, 0  ;;  %1648 = vmatpush3.bf16.msra.mxu1 %v1806_v22  ;;  %v1809_v25 = vld [vmem:[%s2207_s22 + $0x20] sm:$0xff]   ;;  %v1811_v27 = vld [vmem:[%s2207_s22 + $0x10] sm:$0xff]   ;;  %v1812_v28 = vld [vmem:[%s2207_s22 + $0x8] sm:$0xff]  }
 0x148   : > { %1649 = vmatprep.subr.bf16.mxu1 %v1985_v1  ;;  %v1813_v33 = vld [vmem:[%s2207_s22] sm:$0xff]  }
 0x149   : > { %1630 = vmatpush3.bf16.msra.mxu0 %v1805_v2  ;;  %v1139_v39 = vld [vmem:[#allocation4] sm:$0xff] }
 0x14a   : > { %1635 = vmatprep.subr.bf16.mxu0 %v1985_v1 }
 0x14b   : > { %1650 = vmatpush3.bf16.msra.mxu1 %v1807_v23 }
 0x14c   : > { %1632 = vmatmul.mubr.msk.bf16.vlgmr.msra.gmra.mxu0 %vm987_vm4, %v970_v3  ;;  %1651 = vmatprep.subr.bf16.mxu1 %v1985_v1 }
 0x14d   : > { %1636 = vmatpush3.bf16.xpose.msra.mxu0 %v1034_v4  ;;  %1637 = vmatprep.mubr.msk.bf16.mxu0 %vm1986_vm3, %v1985_v1 }
 0x14e   : > { %1641 = vmatprep.subr.bf16.mxu0 %v1985_v1 }
 0x14f   : > { %1652 = vmatpush3.bf16.msra.mxu1 %v1808_v24 }
 0x150   : > { %1653 = vmatprep.subr.bf16.mxu1 %v1985_v1 }
 0x153   : > { %1654 = vmatpush3.bf16.msra.mxu1 %v1809_v25 }
 0x154   : > { %1655 = vmatprep.subr.bf16.mxu1 %v1985_v1 }
 0x157   : > { %1656 = vmatpush3.bf16.msra.mxu1 %v1810_v26 }
 0x158   : > { %1657 = vmatprep.subr.bf16.mxu1 %v1985_v1 }
 0x15b   : > { %1658 = vmatpush3.bf16.msra.mxu1 %v1811_v27 }
 0x15c   : > { %1659 = vmatprep.subr.bf16.mxu1 %v1985_v1 }
 0x15f   : > { %1660 = vmatpush3.bf16.msra.mxu1 %v1812_v28 }
 0x160   : > { %1661 = vmatprep.subr.bf16.mxu1 %v1985_v1 }
 0x163   : > { %1662 = vmatpush3.bf16.msra.mxu1 %v1813_v33 }
 0x20c   : > { %v1025_v5 = vpop.f32.mrf.mxu0 }
 0x20d   : > { %v1031_v6 = vpack.c.bf16 %v1025_v5, %v1025_v5 }
 0x20e   : > { %v1633_v7 = vpop.f32.mrf.mxu0 }
 0x20f   : > { %1638 = vmatmul.mubr.bf16.vlgmr.msra.gmra.mxu0 %v1031_v6 }
 0x210   : > { %v1028_v8 = vpop.f32.mrf.mxu0  ;;  %1643 = vmatprep.mubr.msk.bf16.mxu0 %vm1986_vm3, %v1985_v1  ;;  %1642 = vmatpush3.bf16.msra.mxu0 %v1097_v21 }
 0x212   : > { %v1634_v9 = vpop.f32.mrf.mxu0 }
 0x2cf   : > { %v1072_v10 = vpop.f32.mrf.mxu0 }
 0x2d0   : > { %v1079_v11 = vsel %vm1078_vm5, %v1072_v10, -inf }
 0x2d1   : > { %1080 = vmax.xlane.f32.xlu0 %v1079_v11  ;;  %v1639_v12 = vpop.f32.mrf.mxu0 }
 0x2d3   : > { %v1075_v13 = vpop.f32.mrf.mxu0 }
 0x2d5   : > { %v1640_v14 = vpop.f32.mrf.mxu0 }
 0x35a   : > { %v1081_v15 = vpop.xlane.xlu0 %1080 }
 0x35b   : > { %v1082_v16 = vsub.f32 %v1072_v10, %v1081_v15 }
 0x35d   : > { %v1083_v17 = vmul.f32 1.442695, %v1082_v16 }
 0x35f   : > { %1814 = vpow2.f32 %v1083_v17 }
 0x36c   : > { %v1815_v18 = vpop.eup %1814 }
 0x36d   : > { %v1085_v19 = vsel %vm1078_vm5, %v1815_v18, 0.0 }
 0x36e   : > { %1086 = vadd.xlane.f32.xlu0 %v1085_v19 }
 0x3f7   : > { %v1087_v29 = vpop.xlane.xlu0 %1086 }
 0x3f8   : > { %1816 = vrcp.f32 %v1087_v29 }
 0x405   : > { %v1817_v30 = vpop.eup %1816 }
 0x406   : > { %v1089_v31 = vmul.f32 %v1817_v30, %v1815_v18 }
 0x408   : > { %1090 = vst.msk [vmem:[%s457_s26] sm:$0xff] %vm1078_vm5, %v1089_v31  ;;  %v1091_v32 = vpack.c.bf16 %v1089_v31, %v1089_v31 }
 0x40a   : > { %1644 = vmatmul.mubr.msk.bf16.vlgmr.msra.gmra.mxu0 %vm1078_vm5, %v1091_v32 }
 0x4ca   : > { %v1133_v34 = vpop.f32.mrf.mxu0 }
 0x4cb   : > { %v1140_v35 = vpack.c.bf16 %v1133_v34, %v1133_v34 }
 0x4cc   : > { %v1645_v36 = vpop.f32.mrf.mxu0 }
 0x4cd   : > { %1664 = vmatmul.mubr.bf16.vlgmr.msra.gmra.mxu1 %v1140_v35 }
 0x4ce   : > { %v1136_v37 = vpop.f32.mrf.mxu0 }
 0x4d0   : > { %v1646_v38 = vpop.f32.mrf.mxu0 }
 0x58d   : > { %v1239_v40 = vpop.f32.mrf.mxu1 }
 0x58e   : > { %v1245_v41 = vadd.f32 %v1239_v40, %v1139_v39 }
 0x58f   : > { %v1665_v42 = vpop.f32.mrf.mxu1  ;;  %1250 = sbr.rel (%p1514_p0) target bundleno = 1433 (0x599), region = 101 }
 0x590   : > { %1246 = vst.msk [vmem:[#allocation4] sm:$0xff] %vm987_vm4, %v1245_v41 }
 0x591   : > { %v1242_v43 = vpop.f32.mrf.mxu1 }
 0x593   : > { %v1666_v44 = vpop.f32.mrf.mxu1 }
 0x597   : > { %v1251_v45 = vld [vmem:[#allocation4] sm:$0xff] }
 0x598   : > { %1252 = vst.msk [vmem:[%s450_s17] sm:$0xff] %vm987_vm4, %v1251_v45 }
 0x599 PF: > { %s1517_s30 = sshll.u32 %s1968_s14, 7  ;;  %s2505_s5 = sld [smem:[#allocation30_spill]] }
 0x59a   : > { %s1273_s27 = sshll.u32 %s450_s17, 4  ;;  %s2506_s19 = sand.u32 1, %s1948_s9   ;;  %s1274_s27 = int_to_ptr.vmem [resolvable:$true] %s1273_s27 }
 0x59b   : > { %s1254_s11 = scalar_lea.sflag [#allocation7], %s2506_s19  ;;  %s1818_s24 = scalar_lea.vmem %s1274_s27, 128 }
 0x59c   : > { %p1819_p1 = scmp.ne.s32.totalorder %s1274_s27, %s1818_s24  ;;  %s1987_s18 = smov [#allocation6]  }
 0x59d   : > { %s1822_s12 = sshll.u32 %s1987_s18, 4  ;;  %s1823_s12 = int_to_ptr.vmem [resolvable:$false] %s1822_s12 }
 0x59e   : > { %p1820_p5 = pnand %p1819_p1, %p2134_p10  ;;  %s1824_s15 = scalar_lea.vmem %s1823_s12, 256 }
 0x59f   : > { %s1271_s16 = scalar_lea.hbm %s2505_s5, %s1517_s30  ;;  %p1825_p6 = scmp.lt.s32.totalorder %s1274_s27, %s1823_s12 }
 0x5a0   : > { %p1821_p3 = pneg %p1820_p5  ;;  %p1826_p7 = scmp.lt.s32.totalorder %s1824_s15, %s1818_s24 }
 0x5a2   : > { %p1827_p8 = por %p1826_p7, %p1825_p6 }
 0x5a4   : > { %p1828_p9 = pnand %p1827_p8, %p1821_p3 }
 0x5a6   : > { %1831 = shalt.err (!%p1828_p9)
}
 0x5a7   : > { %s1832_s10 = scalar_lea.hbm %s1271_s16, 128  ;;  %s1836_s29 = scalar_lea.hbm %s2505_s5, 256 }
 0x5a8   : > { %p1833_p11 = scmp.ne.s32.totalorder %s1271_s16, %s1832_s10  ;;  %p1837_p1 = scmp.lt.s32.totalorder %s1271_s16, %s2505_s5 }
 0x5a9   : > { %p1838_p5 = scmp.lt.s32.totalorder %s1836_s29, %s1832_s10 }
 0x5aa   : > { %p1834_p13 = pnand %p1833_p11, %p2134_p10 }
 0x5ab   : > { %p1839_p4 = por %p1838_p5, %p1837_p1 }
 0x5ac   : > { %p1835_p0 = pneg %p1834_p13 }
 0x5ae   : > { %p1840_p12 = pnand %p1839_p4, %p1835_p0 }
 0x5b0   : > { %1843 = shalt.err (!%p1840_p12)
}
 0x5b1   : > { %1667 = dma.vmem_to_hbm [thread:$0]  (%p2134_p10), %s1274_s27, 128, %s1271_s16, %s1254_s11  }
 0x5b2   : > { %s1518_s22 = sshll.u32 %s1968_s14, 2  ;;  %s1289_s20 = sshll.u32 %s457_s26, 4  ;;  %s1290_s20 = int_to_ptr.vmem [resolvable:$true] %s1289_s20 }
 0x5b3   : > { %s1285_s19 = sadd.s32 %s1964_s13, %s1518_s22  ;;  %s2508_s15 = sld [smem:[#allocation31_spill]] }
 0x5b4   : > { %s1519_s24 = sshll.u32 %s1285_s19, 7  ;;  %s2510_s17 = sand.u32 1, %s1936_s28  }
 0x5b5   : > { %s1259_s29 = scalar_lea.sflag [#allocation9], %s2510_s17  ;;  %s1844_s23 = scalar_lea.vmem %s1290_s20, 128 }
 0x5b6   : > { %p1845_p12 = scmp.ne.s32.totalorder %s1290_s20, %s1844_s23  ;;  %s1988_s7 = smov [#allocation8]  }
 0x5b7   : > { %s1848_s3 = sshll.u32 %s1988_s7, 4  ;;  %s1849_s3 = int_to_ptr.vmem [resolvable:$false] %s1848_s3 }
 0x5b8   : > { %p1846_p4 = pnand %p1845_p12, %p2155_p2  ;;  %s1850_s14 = scalar_lea.vmem %s1849_s3, 256 }
 0x5b9   : > { %s2509_s21 = smov %s2508_s15  ;;  %s1287_s10 = scalar_lea.hbm %s2508_s15, %s1519_s24 }
 0x5ba   : > { %p1847_p3 = pneg %p1846_p4  ;;  %p1851_p10 = scmp.lt.s32.totalorder %s1290_s20, %s1849_s3 }
 0x5bb   : > { %p1852_p6 = scmp.lt.s32.totalorder %s1850_s14, %s1844_s23 }
 0x5bd   : > { %p1853_p7 = por %p1852_p6, %p1851_p10 }
 0x5bf   : > { %p1854_p8 = pnand %p1853_p7, %p1847_p3 }
 0x5c1   : > { %1857 = shalt.err (!%p1854_p8)
}
 0x5c2   : > { %s1858_s13 = scalar_lea.hbm %s1287_s10, 128  ;;  %s1862_s16 = scalar_lea.hbm %s2509_s21, 1024 }
 0x5c3   : > { %p1859_p9 = scmp.ne.s32.totalorder %s1287_s10, %s1858_s13  ;;  %p1863_p0 = scmp.lt.s32.totalorder %s1287_s10, %s2509_s21 }
 0x5c4   : > { %p1864_p1 = scmp.lt.s32.totalorder %s1862_s16, %s1858_s13 }
 0x5c5   : > { %p1860_p11 = pnand %p1859_p9, %p2155_p2 }
 0x5c6   : > { %p1865_p5 = por %p1864_p1, %p1863_p0 }
 0x5c7   : > { %p1861_p13 = pneg %p1860_p11 }
 0x5c9   : > { %p1866_p12 = pnand %p1865_p5, %p1861_p13 }
 0x5cb   : > { %1869 = shalt.err (!%p1866_p12)
}
 0x5cc   : > { %1668 = dma.vmem_to_hbm [thread:$0]  (%p2155_p2), %s1290_s20, 128, %s1287_s10, %s1259_s29  }
 0x5cd PF: > { %s2511_s22 = sld [smem:[#allocation19_spill]] }
 0x5ce   : > { %s2512_s19 = sld [smem:[#allocation14_spill]] }
 0x5cf   : > { %s2513_s24 = sld [smem:[#allocation24_spill]] }
 0x5d3   : > { %p1678_p4 = scmp.ge.s32.totalorder %s2511_s22, 2 }
 0x5d4   : > { %s1301_s18 = sand.u32 1, %s2512_s19  }
 0x5d5   : > { %p2514_p3 = scmp.ne.s32.totalorder %s2513_s24, 0  ;;  %s1302_s12 = scalar_lea.sflag [#allocation7], %s1301_s18 }
 0x5d7   : > { %p1672_p10 = pnand %p1678_p4, %p2514_p3 }
 0x5d9   : > { %p1673_p6 = pneg %p1672_p10 }
 0x5db   : > { %1923 = dma.done.wait (%p1673_p6), %s1302_s12, 128  }
 0x5dc   : > { %1925 = vsyncadd (%p1673_p6), %s1302_s12, 4294967168  ;;  %s2515_s15 = sld [smem:[#allocation12_spill]] }
 0x5dd   : > { %s2516_s17 = sld [smem:[#allocation27_spill]] }
 0x5e2   : > { %s1310_s23 = sand.u32 1, %s2515_s15  }
 0x5e3   : > { %p2517_p7 = scmp.ne.s32.totalorder %s2516_s17, 0  ;;  %s1311_s30 = scalar_lea.sflag [#allocation9], %s1310_s23 }
 0x5e5   : > { %p1675_p8 = pnand %p1678_p4, %p2517_p7 }
 0x5e7   : > { %p1676_p9 = pneg %p1675_p8 }
 0x5e9   : > { %1927 = dma.done.wait (%p1676_p9), %s1311_s30, 128  }
 0x5ea   : > { %1929 = vsyncadd (%p1676_p9), %s1311_s30, 4294967168  ;;  %s25_s17 = sadd.s32 1, %s2511_s22   ;;  %s2519_s10 = sld [smem:[#allocation13_spill]] }
 0x5eb   : > { %p2404_p2 = scmp.ge.s32.totalorder %s25_s17, 10   ;;  %s2520_s29 = sld [smem:[#allocation25_spill]] }
 0x5ec   : > { %s2521_s7 = sld [smem:[#allocation15_spill]]  ;;  %s2529_s27 = smov %s1936_s28 }
 0x5ed   : > { %s2522_s3 = sld [smem:[#allocation23_spill]]  ;;  %s2531_s30 = smov %s1948_s9 }
 0x5ee   : > { %s2523_s11 = sld [smem:[#allocation16_spill]] }
 0x5ef   : > { %s2524_s12 = sld [smem:[#allocation22_spill]]  ;;  %24 = sbr.rel (!%p2404_p2) target bundleno = 15 (0xf), region = 178 }
 0x5f0   : > { %s2525_s13 = sld [smem:[#allocation17_spill]]  ;;  %s2530_s28 = smov %s2519_s10 }
 0x5f1   : > { %s2526_s14 = sld [smem:[#allocation18_spill]] }
 0x5f2   : > { %s2527_s15 = sld [smem:[#allocation20_spill]]  ;;  %s2532_s9 = smov %s2521_s7 }
 0x5f3   : > { %s2528_s16 = sld [smem:[#allocation21_spill]]  ;;  %s2533_s10 = smov %s2522_s3 }
 0x5f4   :  { %1316 = vsyncpa [#allocation7], 1 }
 0x5f5   :  { %1318 = vsyncpa [#allocation7 + $0x1], 1 }
 0x5f6   :  { %1319 = vsyncpa [#allocation9], 1 }
 0x5f7   :  { %1321 = vsyncpa [#allocation9 + $0x1], 1 }

</bundles_post_ra>
